<compile_context>
chip_gen: v7x
topology: tpu7x:2x2x1
jax: 0.10.0
libtpu: 0.0.40
codegen_flags: <defaults>
</compile_context>

<pallas_src>
import functools

import jax
import jax.numpy as jnp
import numpy as np
from jax.experimental import pallas as pl
from jax.experimental.pallas import tpu as pltpu

MARGIN = 1.0          # stored by __init__ but unused in the active forward()
TAU = 0.1             # self.tau
INV_TAU = 1.0 / TAU   # multiply, never divide, inside the kernel
_HARD_MARGIN = 0.1    # the +/-0.1 hard-mining margin in forward()
_LABEL_PAD = jnp.iinfo(jnp.int32).min  # sentinel label for padded rows/cols
_BIG = 1e30


def _round_up(x, m):
    return ((x + m - 1) // m) * m


def _pick_vmem_limit():
    """~96 MiB on v5e/v6e (128 MiB physical VMEM), ~48 MiB on v7x (64 MiB)."""
    try:
        cap = int(pltpu.get_tpu_info().vmem_capacity_bytes)
    except Exception:
        cap = 64 * 1024 * 1024   # conservative fallback: assume smallest (v7x)
    return int(min(cap * 3 // 4, 100 * 1024 * 1024))


def lifted_loss_kernel(emb_r_ref, emb_c_ref, lab_r_ref, lab_c_ref, out_ref,
                       pos_min_sc, neg_max_sc, pos_sum_sc, neg_sum_sc,
                       *, n_valid):
    tile_r = emb_r_ref.shape[0]
    tile_c = emb_c_ref.shape[0]
    p = pl.program_id(1)                 # 0: min/max pass, 1: exp-sum pass
    c = pl.program_id(2)
    last_c = pl.num_programs(2) - 1

    @pl.when(jnp.logical_and(p == 0, c == 0))
    def _init():
        pos_min_sc[...] = jnp.full_like(pos_min_sc, _BIG)
        neg_max_sc[...] = jnp.full_like(neg_max_sc, -_BIG)
        pos_sum_sc[...] = jnp.zeros_like(pos_sum_sc)
        neg_sum_sc[...] = jnp.zeros_like(neg_sum_sc)

    # sim[i, j] = <emb_i, emb_j> on the MXU; "NT" contraction avoids an
    # explicit transpose.  DEFAULT precision in the input dtype, f32 acc.
    sim = jax.lax.dot_general(
        emb_r_ref[...], emb_c_ref[...], (((1,), (1,)), ((), ())),
        preferred_element_type=jnp.float32)              # (tile_r, tile_c) f32

    # (tile_r, 1) row ids vs (1, tile_c) col ids; the != broadcast does the
    # diagonal exclusion without materializing full-plane iota temporaries.
    row_ids = (pl.program_id(0) * tile_r
               + jax.lax.broadcasted_iota(jnp.int32, (tile_r, 1), 0))
    col_ids = (c * tile_c
               + jax.lax.broadcasted_iota(jnp.int32, (1, tile_c), 1))
    not_self = row_ids != col_ids                        # (tile_r, tile_c)
    col_real = col_ids < n_valid                         # (1, tile_c)

    same = lab_r_ref[...] == lab_c_ref[...]              # (tile_r, tile_c)
    # Explicit self-pair exclusion is matmul-precision independent; the
    # reference's 0.999 near-duplicate filter is kept on top.
    pos_mask = (same & not_self) & (sim < 0.999)
    # Padded columns (zero embedding, sentinel label) must not enter the
    # negative set; padded *rows* are masked at finalize via row_ids < n.
    neg_mask = jnp.logical_not(same) & col_real

    @pl.when(p == 0)
    def _pass_minmax():
        pos_min_sc[...] = jnp.minimum(
            pos_min_sc[...],
            jnp.min(jnp.where(pos_mask, sim, _BIG), axis=1, keepdims=True))
        neg_max_sc[...] = jnp.maximum(
            neg_max_sc[...],
            jnp.max(jnp.where(neg_mask, sim, -_BIG), axis=1, keepdims=True))

    @pl.when(p == 1)
    def _pass_sums():
        # Hoisted hard-mining thresholds: (tile_r, 1) vectors, broadcast into
        # the compares (no per-element +/-0.1 adds).
        neg_thr = pos_min_sc[...] - _HARD_MARGIN   # sel_neg: sim > neg_thr
        pos_thr = neg_max_sc[...] + _HARD_MARGIN   # sel_pos: sim < pos_thr
        sel_neg = neg_mask & (sim > neg_thr)
        sel_pos = pos_mask & (sim < pos_thr)
        # One exp per element (selections are disjoint): negatives need
        # exp(+sim/tau), positives exp(-sim/tau).
        e = jnp.exp(jnp.where(sel_neg, INV_TAU, -INV_TAU) * sim)
        pos_sum_sc[...] += jnp.sum(jnp.where(sel_pos, e, 0.0),
                                   axis=1, keepdims=True)
        neg_sum_sc[...] += jnp.sum(jnp.where(sel_neg, e, 0.0),
                                   axis=1, keepdims=True)

    @pl.when(jnp.logical_and(p == 1, c == last_c))
    def _finalize():
        pos_loss = (2.0 * TAU) * jnp.log(jnp.maximum(pos_sum_sc[...], 1e-30))
        neg_loss = (2.0 * TAU) * jnp.log(jnp.maximum(neg_sum_sc[...], 1e-30))
        # Row validity (torch IndexError / "c += 1; continue" paths) collapses
        # to pos_min - 0.1 < neg_max: sel_pos non-empty iff
        # pos_min - 0.1 < neg_max, sel_neg non-empty iff neg_max + 0.1 >
        # pos_min (same condition); the BIG/-BIG sentinels already make it
        # false for empty pos/neg sets.  Padded rows are masked explicitly.
        valid = ((pos_min_sc[...] - _HARD_MARGIN) < neg_max_sc[...]) \
            & (row_ids < n_valid)
        out_ref[...] = jnp.where(valid, pos_loss + neg_loss, 0.0)  # (tile_r,1)


def lifted_loss(embedding, label, *, tile_r=256, tile_c=1024,
                compute_dtype=jnp.bfloat16):
    """Returns (loss, 0, 0) like the PyTorch module.

    embedding: (n, d) float array.  It is cast to `compute_dtype` (bf16 by
               default: halves HBM traffic / VMEM and uses a single bf16 MXU
               pass).  Pass compute_dtype=jnp.float32 for full reference
               fidelity — accumulation is in f32 either way.
    label:     (n,) integer array.
    """
    n, d = embedding.shape
    emb = embedding.astype(compute_dtype)
    lab = label.astype(jnp.int32)

    itemsize = jnp.dtype(compute_dtype).itemsize
    # Keep the double-buffered column block under ~8 MiB so the per-step
    # working set (col block + row block + a few (tile_r, tile_c) f32 planes)
    # stays far below every generation's VMEM, independent of n.
    tc_cap = max(128, ((8 * 1024 * 1024) // (2 * d * itemsize)) // 128 * 128)
    tile_c = min(tile_c, tc_cap, _round_up(n, 128))   # always a multiple of 128
    tile_r = min(tile_r, _round_up(n, 8))             # always a multiple of 8

    n_pad_r = _round_up(n, tile_r)
    n_pad_c = _round_up(n, tile_c)
    num_r = n_pad_r // tile_r
    num_c = n_pad_c // tile_c

    # Padded rows: zero embedding + sentinel label -> invalid -> contribute 0.
    # Padded cols: excluded from pos (label mismatch) and neg (col_real mask).
    emb_rows = emb if n_pad_r == n else jnp.pad(emb, ((0, n_pad_r - n), (0, 0)))
    emb_cols = emb if n_pad_c == n else jnp.pad(emb, ((0, n_pad_c - n), (0, 0)))
    lab_rows = (lab if n_pad_r == n
                else jnp.pad(lab, (0, n_pad_r - n), constant_values=_LABEL_PAD))
    lab_cols = (lab if n_pad_c == n
                else jnp.pad(lab, (0, n_pad_c - n), constant_values=_LABEL_PAD))
    lab_rows = lab_rows.reshape(n_pad_r, 1)
    lab_cols = lab_cols.reshape(1, n_pad_c)

    kernel = functools.partial(lifted_loss_kernel, n_valid=n)

    row_losses = pl.pallas_call(
        kernel,
        out_shape=jax.ShapeDtypeStruct((n_pad_r, 1), jnp.float32),
        grid=(num_r, 2, num_c),
        in_specs=[
            pl.BlockSpec((tile_r, d), lambda r, p, c: (r, 0)),  # query rows
            pl.BlockSpec((tile_c, d), lambda r, p, c: (c, 0)),  # column tile
            pl.BlockSpec((tile_r, 1), lambda r, p, c: (r, 0)),  # row labels
            pl.BlockSpec((1, tile_c), lambda r, p, c: (0, c)),  # col labels
        ],
        out_specs=pl.BlockSpec((tile_r, 1), lambda r, p, c: (r, 0)),
        scratch_shapes=[
            pltpu.VMEM((tile_r, 1), jnp.float32),   # pos_min
            pltpu.VMEM((tile_r, 1), jnp.float32),   # neg_max
            pltpu.VMEM((tile_r, 1), jnp.float32),   # pos_sum
            pltpu.VMEM((tile_r, 1), jnp.float32),   # neg_sum
        ],
        compiler_params=pltpu.CompilerParams(
            # Row blocks are independent -> megacore split on v7x; the pass
            # and column axes carry the per-row reduction -> "arbitrary".
            dimension_semantics=("parallel", "arbitrary", "arbitrary"),
            vmem_limit_bytes=_pick_vmem_limit(),
        ),
    )(emb_rows, emb_cols, lab_rows, lab_cols)

    # Reference divides by n (all rows, including skipped ones).
    loss = jnp.sum(row_losses) / n
    return loss, 0, 0


def _reference_loss(emb, lab, tau=TAU):
    """Pure numpy replica of the PyTorch forward (hard_mining=True)."""
    emb = np.asarray(emb, dtype=np.float64)
    lab = np.asarray(lab)
    n = emb.shape[0]
    sim = emb @ emb.T
    losses = []
    for i in range(n):
        pos_ = sim[i][(lab == lab[i]) & (sim[i] < 0.999)]
        neg_ = sim[i][lab != lab[i]]
        if pos_.size == 0 or neg_.size == 0:   # torch IndexError path
            continue
        neg_sel = neg_[neg_ + 0.1 > pos_.min()]
        pos_sel = pos_[pos_ - 0.1 < neg_.max()]
        if neg_sel.size < 1 or pos_sel.size < 1:
            continue
        pos_loss = 2.0 * tau * np.log(np.sum(np.exp(-pos_sel / tau)))
        neg_loss = 2.0 * tau * np.log(np.sum(np.exp(neg_sel / tau)))
        losses.append(pos_loss + neg_loss)
    return (sum(losses) / n) if losses else 0.0


def _make_test_inputs(d=32):
    """4 classes x 2 members, built so every hard-mining comparison sits
    >= 0.04 away from its decision boundary (robust to bf16 compute),
    while exercising full / partial / empty negative selections."""
    a = np.array([0.20, 0.60, 0.45, 0.10])    # shared-direction coefficient
    p = np.array([0.05, 0.30, -0.20, 0.70])   # within-class similarity
    emb = np.zeros((8, d), dtype=np.float32)
    for k in range(4):
        b = np.sqrt((1.0 + p[k] - 2.0 * a[k] ** 2) / 2.0)
        w = np.sqrt((1.0 - p[k]) / 2.0)
        for m in range(2):
            v = np.zeros(d, dtype=np.float64)
            v[0] = a[k]                               # shared direction
            v[1 + k] = b                              # class direction
            v[5 + k] = (1.0 if m == 0 else -1.0) * w  # member direction
            emb[2 * k + m] = v
    label = np.array([0, 0, 1, 1, 2, 2, 3, 3], dtype=np.int32)
    return jnp.asarray(emb), jnp.asarray(label)


if __name__ == "__main__":
    embedding, label = _make_test_inputs(d=32)

    # Mix with a random orthogonal basis (deterministic, PRNGKey(0)) so the
    # embeddings look like dense real features; inner products (hence the
    # loss and all decision margins) are preserved.
    q, _ = jnp.linalg.qr(jax.random.normal(jax.random.PRNGKey(0), (32, 32),
                                           dtype=jnp.float32))
    embedding = (embedding @ q).astype(jnp.float32)

    ref = _reference_loss(np.asarray(embedding), np.asarray(label))

    # Reference-fidelity path (f32 inputs, f32 accumulation).
    loss_f32, _, _ = lifted_loss(embedding, label, compute_dtype=jnp.float32)
    loss_f32 = jax.block_until_ready(loss_f32)
    np.testing.assert_allclose(np.asarray(loss_f32), ref, rtol=2e-2, atol=5e-3)

    # Default fast path (bf16 inputs, single bf16 MXU pass, f32 accumulation).
    loss_bf16, _, _ = lifted_loss(embedding, label)
    loss_bf16 = jax.block_until_ready(loss_bf16)
    np.testing.assert_allclose(np.asarray(loss_bf16), ref, rtol=5e-2, atol=3e-2)

    print("KERNEL_OK")
</pallas_src>

<mosaic_0001>
module attributes {stable_mosaic.version = 11 : i64} {
  func.func @lifted_loss_kernel(%arg0: i32, %arg1: i32, %arg2: i32, %arg3: memref<8x32xf32, #tpu.memory_space<vmem>>, %arg4: memref<128x32xf32, #tpu.memory_space<vmem>>, %arg5: memref<8x1xi32, #tpu.memory_space<vmem>>, %arg6: memref<1x128xi32, #tpu.memory_space<vmem>>, %arg7: memref<8x1xf32, #tpu.memory_space<vmem>>, %arg8: memref<8x1xf32, #tpu.memory_space<vmem>>, %arg9: memref<8x1xf32, #tpu.memory_space<vmem>>, %arg10: memref<8x1xf32, #tpu.memory_space<vmem>>, %arg11: memref<8x1xf32, #tpu.memory_space<vmem>>) attributes {dimension_semantics = [#tpu.dimension_semantics<parallel>, #tpu.dimension_semantics<arbitrary>, #tpu.dimension_semantics<arbitrary>], iteration_bounds = array<i64: 1, 2, 1>, scalar_prefetch = 0 : i64, scratch_operands = 4 : i64, tpu.core_type = #tpu.core_type<tc>, window_params = [{transform_indices = @transform_0, window_bounds = array<i64: 8, 32>}, {transform_indices = @transform_1, window_bounds = array<i64: 128, 32>}, {transform_indices = @transform_2, window_bounds = array<i64: 8, 1>}, {transform_indices = @transform_3, window_bounds = array<i64: 1, 128>}, {transform_indices = @transform_4, window_bounds = array<i64: 8, 1>}]} {
    %c0_i32 = arith.constant 0 : i32
    %0 = arith.cmpi eq, %arg1, %c0_i32 : i32
    %c0_i32_0 = arith.constant 0 : i32
    %1 = arith.cmpi eq, %arg2, %c0_i32_0 : i32
    %2 = arith.andi %0, %1 : i1
    %3 = arith.extui %2 : i1 to i32
    %c0_i32_1 = arith.constant 0 : i32
    %4 = arith.cmpi ne, %3, %c0_i32_1 : i32
    scf.if %4 {
      %cst_18 = arith.constant 1.000000e+30 : f32
      %44 = vector.broadcast %cst_18 : f32 to vector<8x1xf32>
      %c0_19 = arith.constant 0 : index
      %c0_20 = arith.constant 0 : index
      %45 = vector.load %arg8[%c0_19, %c0_20] : memref<8x1xf32, #tpu.memory_space<vmem>>, vector<8x1xf32>
      tpu.vector_store %arg8[%c0_19, %c0_20], %44 {strides = array<i32>} : memref<8x1xf32, #tpu.memory_space<vmem>>, vector<8x1xf32>,
      %cst_21 = arith.constant -1.000000e+30 : f32
      %46 = vector.broadcast %cst_21 : f32 to vector<8x1xf32>
      %c0_22 = arith.constant 0 : index
      %c0_23 = arith.constant 0 : index
      %47 = vector.load %arg9[%c0_22, %c0_23] : memref<8x1xf32, #tpu.memory_space<vmem>>, vector<8x1xf32>
      tpu.vector_store %arg9[%c0_22, %c0_23], %46 {strides = array<i32>} : memref<8x1xf32, #tpu.memory_space<vmem>>, vector<8x1xf32>,
      %cst_24 = arith.constant 0.000000e+00 : f32
      %48 = vector.broadcast %cst_24 : f32 to vector<8x1xf32>
      %c0_25 = arith.constant 0 : index
      %c0_26 = arith.constant 0 : index
      %49 = vector.load %arg10[%c0_25, %c0_26] : memref<8x1xf32, #tpu.memory_space<vmem>>, vector<8x1xf32>
      tpu.vector_store %arg10[%c0_25, %c0_26], %48 {strides = array<i32>} : memref<8x1xf32, #tpu.memory_space<vmem>>, vector<8x1xf32>,
      %cst_27 = arith.constant 0.000000e+00 : f32
      %50 = vector.broadcast %cst_27 : f32 to vector<8x1xf32>
      %c0_28 = arith.constant 0 : index
      %c0_29 = arith.constant 0 : index
      %51 = vector.load %arg11[%c0_28, %c0_29] : memref<8x1xf32, #tpu.memory_space<vmem>>, vector<8x1xf32>
      tpu.vector_store %arg11[%c0_28, %c0_29], %50 {strides = array<i32>} : memref<8x1xf32, #tpu.memory_space<vmem>>, vector<8x1xf32>,
    } else {
    }
    %c0 = arith.constant 0 : index
    %c0_2 = arith.constant 0 : index
    %5 = vector.load %arg3[%c0, %c0_2] : memref<8x32xf32, #tpu.memory_space<vmem>>, vector<8x32xf32>
    %c0_3 = arith.constant 0 : index
    %c0_4 = arith.constant 0 : index
    %6 = vector.load %arg4[%c0_3, %c0_4] : memref<128x32xf32, #tpu.memory_space<vmem>>, vector<128x32xf32>
    %cst = arith.constant dense<0.000000e+00> : vector<8x128xf32>
    %7 = tpu.matmul %5, %6, %cst {dimension_numbers = #tpu.dot_dimension_numbers<[1], [1], [0], [0], [0, 0, 1, 0], [], []>} : vector<8x32xf32>, vector<128x32xf32>, vector<8x128xf32> -> vector<8x128xf32>
    %c8_i32 = arith.constant 8 : i32
    %8 = arith.muli %arg0, %c8_i32 : i32
    %9 = tpu.iota {dimensions = array<i32: 0>} : vector<8x1xi32>
    %10 = vector.broadcast %8 : i32 to vector<8x1xi32>
    %11 = arith.addi %10, %9 : vector<8x1xi32>
    %c128_i32 = arith.constant 128 : i32
    %12 = arith.muli %arg2, %c128_i32 : i32
    %13 = tpu.iota {dimensions = array<i32: 1>} : vector<1x128xi32>
    %14 = vector.broadcast %12 : i32 to vector<1x128xi32>
    %15 = arith.addi %14, %13 : vector<1x128xi32>
    %16 = vector.broadcast %11 : vector<8x1xi32> to vector<8x128xi32>
    %17 = vector.broadcast %15 : vector<1x128xi32> to vector<8x128xi32>
    %18 = arith.cmpi ne, %16, %17 : vector<8x128xi32>
    %c8_i32_5 = arith.constant 8 : i32
    %19 = vector.broadcast %c8_i32_5 : i32 to vector<1x128xi32>
    %20 = arith.cmpi slt, %15, %19 : vector<1x128xi32>
    %c0_6 = arith.constant 0 : index
    %c0_7 = arith.constant 0 : index
    %21 = vector.load %arg5[%c0_6, %c0_7] : memref<8x1xi32, #tpu.memory_space<vmem>>, vector<8x1xi32>
    %c0_8 = arith.constant 0 : index
    %c0_9 = arith.constant 0 : index
    %22 = vector.load %arg6[%c0_8, %c0_9] : memref<1x128xi32, #tpu.memory_space<vmem>>, vector<1x128xi32>
    %23 = vector.broadcast %21 : vector<8x1xi32> to vector<8x128xi32>
    %24 = vector.broadcast %22 : vector<1x128xi32> to vector<8x128xi32>
    %25 = arith.cmpi eq, %23, %24 : vector<8x128xi32>
    %26 = arith.andi %25, %18 : vector<8x128xi1>
    %cst_10 = arith.constant 9.990000e-01 : f32
    %27 = vector.broadcast %cst_10 : f32 to vector<8x128xf32>
    %28 = arith.cmpf olt, %7, %27 : vector<8x128xf32>
    %29 = arith.andi %26, %28 : vector<8x128xi1>
    %cst_11 = arith.constant dense<true> : vector<8x128xi1>
    %30 = arith.xori %25, %cst_11 : vector<8x128xi1>
    %31 = vector.broadcast %20 : vector<1x128xi1> to vector<8x128xi1>
    %32 = arith.andi %30, %31 : vector<8x128xi1>
    %c0_i32_12 = arith.constant 0 : i32
    %33 = arith.cmpi eq, %arg1, %c0_i32_12 : i32
    %34 = arith.extui %33 : i1 to i32
    %c0_i32_13 = arith.constant 0 : i32
    %35 = arith.cmpi ne, %34, %c0_i32_13 : i32
    scf.if %35 {
      %c0_18 = arith.constant 0 : index
      %c0_19 = arith.constant 0 : index
      %44 = vector.load %arg8[%c0_18, %c0_19] : memref<8x1xf32, #tpu.memory_space<vmem>>, vector<8x1xf32>
      %cst_20 = arith.constant 1.000000e+30 : f32
      %45 = vector.broadcast %cst_20 : f32 to vector<8x128xf32>
      %46 = arith.select %29, %7, %45 : vector<8x128xi1>, vector<8x128xf32>
      %cst_21 = arith.constant dense<0x7F800000> : vector<8xf32>
      %47 = vector.multi_reduction <minimumf>, %46, %cst_21 [1] : vector<8x128xf32> to vector<8xf32>
      %48 = vector.shape_cast %47 : vector<8xf32> to vector<8x1xf32>
      %49 = arith.minimumf %44, %48 : vector<8x1xf32>
      %c0_22 = arith.constant 0 : index
      %c0_23 = arith.constant 0 : index
      %50 = vector.load %arg8[%c0_22, %c0_23] : memref<8x1xf32, #tpu.memory_space<vmem>>, vector<8x1xf32>
      tpu.vector_store %arg8[%c0_22, %c0_23], %49 {strides = array<i32>} : memref<8x1xf32, #tpu.memory_space<vmem>>, vector<8x1xf32>,
      %c0_24 = arith.constant 0 : index
      %c0_25 = arith.constant 0 : index
      %51 = vector.load %arg9[%c0_24, %c0_25] : memref<8x1xf32, #tpu.memory_space<vmem>>, vector<8x1xf32>
      %cst_26 = arith.constant -1.000000e+30 : f32
      %52 = vector.broadcast %cst_26 : f32 to vector<8x128xf32>
      %53 = arith.select %32, %7, %52 : vector<8x128xi1>, vector<8x128xf32>
      %cst_27 = arith.constant dense<0xFF800000> : vector<8xf32>
      %54 = vector.multi_reduction <maximumf>, %53, %cst_27 [1] : vector<8x128xf32> to vector<8xf32>
      %55 = vector.shape_cast %54 : vector<8xf32> to vector<8x1xf32>
      %56 = arith.maximumf %51, %55 : vector<8x1xf32>
      %c0_28 = arith.constant 0 : index
      %c0_29 = arith.constant 0 : index
      %57 = vector.load %arg9[%c0_28, %c0_29] : memref<8x1xf32, #tpu.memory_space<vmem>>, vector<8x1xf32>
      tpu.vector_store %arg9[%c0_28, %c0_29], %56 {strides = array<i32>} : memref<8x1xf32, #tpu.memory_space<vmem>>, vector<8x1xf32>,
    } else {
    }
    %c1_i32 = arith.constant 1 : i32
    %36 = arith.cmpi eq, %arg1, %c1_i32 : i32
    %37 = arith.extui %36 : i1 to i32
    %c0_i32_14 = arith.constant 0 : i32
    %38 = arith.cmpi ne, %37, %c0_i32_14 : i32
    scf.if %38 {
      %c0_18 = arith.constant 0 : index
      %c0_19 = arith.constant 0 : index
      %44 = vector.load %arg8[%c0_18, %c0_19] : memref<8x1xf32, #tpu.memory_space<vmem>>, vector<8x1xf32>
      %cst_20 = arith.constant 1.000000e-01 : f32
      %45 = vector.broadcast %cst_20 : f32 to vector<8x1xf32>
      %46 = arith.subf %44, %45 : vector<8x1xf32>
      %c0_21 = arith.constant 0 : index
      %c0_22 = arith.constant 0 : index
      %47 = vector.load %arg9[%c0_21, %c0_22] : memref<8x1xf32, #tpu.memory_space<vmem>>, vector<8x1xf32>
      %cst_23 = arith.constant 1.000000e-01 : f32
      %48 = vector.broadcast %cst_23 : f32 to vector<8x1xf32>
      %49 = arith.addf %47, %48 : vector<8x1xf32>
      %50 = vector.broadcast %46 : vector<8x1xf32> to vector<8x128xf32>
      %51 = arith.cmpf ogt, %7, %50 : vector<8x128xf32>
      %52 = arith.andi %32, %51 : vector<8x128xi1>
      %53 = vector.broadcast %49 : vector<8x1xf32> to vector<8x128xf32>
      %54 = arith.cmpf olt, %7, %53 : vector<8x128xf32>
      %55 = arith.andi %29, %54 : vector<8x128xi1>
      %cst_24 = arith.constant 1.000000e+01 : f32
      %cst_25 = arith.constant -1.000000e+01 : f32
      %56 = vector.broadcast %cst_24 : f32 to vector<8x128xf32>
      %57 = vector.broadcast %cst_25 : f32 to vector<8x128xf32>
      %58 = arith.select %52, %56, %57 : vector<8x128xi1>, vector<8x128xf32>
      %59 = arith.mulf %58, %7 : vector<8x128xf32>
      %60 = math.exp %59 : vector<8x128xf32>
      %c0_26 = arith.constant 0 : index
      %c0_27 = arith.constant 0 : index
      %61 = vector.load %arg10[%c0_26, %c0_27] : memref<8x1xf32, #tpu.memory_space<vmem>>, vector<8x1xf32>
      %cst_28 = arith.constant 0.000000e+00 : f32
      %62 = vector.broadcast %cst_28 : f32 to vector<8x128xf32>
      %63 = arith.select %55, %60, %62 : vector<8x128xi1>, vector<8x128xf32>
      %cst_29 = arith.constant dense<0.000000e+00> : vector<8xf32>
      %64 = vector.multi_reduction <add>, %63, %cst_29 [1] : vector<8x128xf32> to vector<8xf32>
      %65 = vector.shape_cast %64 : vector<8xf32> to vector<8x1xf32>
      %66 = arith.addf %61, %65 : vector<8x1xf32>
      %c0_30 = arith.constant 0 : index
      %c0_31 = arith.constant 0 : index
      %67 = vector.load %arg10[%c0_30, %c0_31] : memref<8x1xf32, #tpu.memory_space<vmem>>, vector<8x1xf32>
      tpu.vector_store %arg10[%c0_30, %c0_31], %66 {strides = array<i32>} : memref<8x1xf32, #tpu.memory_space<vmem>>, vector<8x1xf32>,
      %c0_32 = arith.constant 0 : index
      %c0_33 = arith.constant 0 : index
      %68 = vector.load %arg11[%c0_32, %c0_33] : memref<8x1xf32, #tpu.memory_space<vmem>>, vector<8x1xf32>
      %cst_34 = arith.constant 0.000000e+00 : f32
      %69 = vector.broadcast %cst_34 : f32 to vector<8x128xf32>
      %70 = arith.select %52, %60, %69 : vector<8x128xi1>, vector<8x128xf32>
      %cst_35 = arith.constant dense<0.000000e+00> : vector<8xf32>
      %71 = vector.multi_reduction <add>, %70, %cst_35 [1] : vector<8x128xf32> to vector<8xf32>
      %72 = vector.shape_cast %71 : vector<8xf32> to vector<8x1xf32>
      %73 = arith.addf %68, %72 : vector<8x1xf32>
      %c0_36 = arith.constant 0 : index
      %c0_37 = arith.constant 0 : index
      %74 = vector.load %arg11[%c0_36, %c0_37] : memref<8x1xf32, #tpu.memory_space<vmem>>, vector<8x1xf32>
      tpu.vector_store %arg11[%c0_36, %c0_37], %73 {strides = array<i32>} : memref<8x1xf32, #tpu.memory_space<vmem>>, vector<8x1xf32>,
    } else {
    }
    %c1_i32_15 = arith.constant 1 : i32
    %39 = arith.cmpi eq, %arg1, %c1_i32_15 : i32
    %c0_i32_16 = arith.constant 0 : i32
    %40 = arith.cmpi eq, %arg2, %c0_i32_16 : i32
    %41 = arith.andi %39, %40 : i1
    %42 = arith.extui %41 : i1 to i32
    %c0_i32_17 = arith.constant 0 : i32
    %43 = arith.cmpi ne, %42, %c0_i32_17 : i32
    scf.if %43 {
      %c0_18 = arith.constant 0 : index
      %c0_19 = arith.constant 0 : index
      %44 = vector.load %arg10[%c0_18, %c0_19] : memref<8x1xf32, #tpu.memory_space<vmem>>, vector<8x1xf32>
      %cst_20 = arith.constant 1.000000e-30 : f32
      %45 = vector.broadcast %cst_20 : f32 to vector<8x1xf32>
      %46 = arith.maximumf %44, %45 : vector<8x1xf32>
      %47 = math.log %46 : vector<8x1xf32>
      %cst_21 = arith.constant 2.000000e-01 : f32
      %48 = vector.broadcast %cst_21 : f32 to vector<8x1xf32>
      %49 = arith.mulf %48, %47 : vector<8x1xf32>
      %c0_22 = arith.constant 0 : index
      %c0_23 = arith.constant 0 : index
      %50 = vector.load %arg11[%c0_22, %c0_23] : memref<8x1xf32, #tpu.memory_space<vmem>>, vector<8x1xf32>
      %cst_24 = arith.constant 1.000000e-30 : f32
      %51 = vector.broadcast %cst_24 : f32 to vector<8x1xf32>
      %52 = arith.maximumf %50, %51 : vector<8x1xf32>
      %53 = math.log %52 : vector<8x1xf32>
      %cst_25 = arith.constant 2.000000e-01 : f32
      %54 = vector.broadcast %cst_25 : f32 to vector<8x1xf32>
      %55 = arith.mulf %54, %53 : vector<8x1xf32>
      %c0_26 = arith.constant 0 : index
      %c0_27 = arith.constant 0 : index
      %56 = vector.load %arg8[%c0_26, %c0_27] : memref<8x1xf32, #tpu.memory_space<vmem>>, vector<8x1xf32>
      %cst_28 = arith.constant 1.000000e-01 : f32
      %57 = vector.broadcast %cst_28 : f32 to vector<8x1xf32>
      %58 = arith.subf %56, %57 : vector<8x1xf32>
      %c0_29 = arith.constant 0 : index
      %c0_30 = arith.constant 0 : index
      %59 = vector.load %arg9[%c0_29, %c0_30] : memref<8x1xf32, #tpu.memory_space<vmem>>, vector<8x1xf32>
      %60 = arith.cmpf olt, %58, %59 : vector<8x1xf32>
      %c8_i32_31 = arith.constant 8 : i32
      %61 = vector.broadcast %c8_i32_31 : i32 to vector<8x1xi32>
      %62 = arith.cmpi slt, %11, %61 : vector<8x1xi32>
      %63 = arith.andi %60, %62 : vector<8x1xi1>
      %64 = arith.addf %49, %55 : vector<8x1xf32>
      %cst_32 = arith.constant 0.000000e+00 : f32
      %65 = vector.broadcast %cst_32 : f32 to vector<8x1xf32>
      %66 = arith.select %63, %64, %65 : vector<8x1xi1>, vector<8x1xf32>
      %c0_33 = arith.constant 0 : index
      %c0_34 = arith.constant 0 : index
      %67 = vector.load %arg7[%c0_33, %c0_34] : memref<8x1xf32, #tpu.memory_space<vmem>>, vector<8x1xf32>
      tpu.vector_store %arg7[%c0_33, %c0_34], %66 {strides = array<i32>} : memref<8x1xf32, #tpu.memory_space<vmem>>, vector<8x1xf32>,
    } else {
    }
    return
  }
  func.func @transform_0(%arg0: i32, %arg1: i32, %arg2: i32) -> (i32, i32) {
    %c0_i32 = arith.constant 0 : i32
    %c0_i32_0 = arith.constant 0 : i32
    return %arg0, %c0_i32 : i32, i32
  }
  func.func @transform_1(%arg0: i32, %arg1: i32, %arg2: i32) -> (i32, i32) {
    %c0_i32 = arith.constant 0 : i32
    %c0_i32_0 = arith.constant 0 : i32
    return %arg2, %c0_i32 : i32, i32
  }
  func.func @transform_2(%arg0: i32, %arg1: i32, %arg2: i32) -> (i32, i32) {
    %c0_i32 = arith.constant 0 : i32
    %c0_i32_0 = arith.constant 0 : i32
    return %arg0, %c0_i32 : i32, i32
  }
  func.func @transform_3(%arg0: i32, %arg1: i32, %arg2: i32) -> (i32, i32) {
    %c0_i32 = arith.constant 0 : i32
    %c0_i32_0 = arith.constant 0 : i32
    return %c0_i32, %arg2 : i32, i32
  }
  func.func @transform_4(%arg0: i32, %arg1: i32, %arg2: i32) -> (i32, i32) {
    %c0_i32 = arith.constant 0 : i32
    %c0_i32_0 = arith.constant 0 : i32
    return %arg0, %c0_i32 : i32, i32
  }
}

</mosaic_0001>

<bundles_post_ra>
// kernel: tpu_custom_call.1
= control target key start
LH: loop header
LB: loop body
LE: loop exit
PB: predicated region body
PF: predicated region fallthrough
CT: control target
= control target key end

     0   :  { %s851_s15 = smov 0   ;;  %s853_s16 = smov 0   ;;  %s985_s0 = inlined_call_operand.vmem [shape: f32[8,32], index: 0, kind: input, shape index: {}]   ;;  %s986_s1 = inlined_call_operand.vmem [shape: f32[128,32], index: 1, kind: input, shape index: {}]   ;;  %s987_s2 = inlined_call_operand.vmem [shape: s32[8,1], index: 2, kind: input, shape index: {}]   ;;  %s988_s3 = inlined_call_operand.vmem [shape: s32[1,128], index: 3, kind: input, shape index: {}]   ;;  %s989_s4 = inlined_call_operand.vmem [shape: f32[8,1], index: 4, kind: output, shape index: {}]  }
   0x1   :  { %s855_s17 = smov 0  }
   0x2 LB: > { %s29_s18 = sadd.s32 1, %s810_s16  ;;  %p636_p0 = scmp.ge.s32.totalorder %s814_s17, 1  ;;  %s814_s17 = sphi %s855_s17, %s14_s17   ;;  %s810_s16 = sphi %s853_s16, %s997_s16   ;;  %s806_s15 = sphi %s851_s15, %s996_s15  }
   0x3   : > { %p31_p1 = scmp.ge.s32.totalorder %s29_s18, 2  ;;  %p208_p2 = scmp.lt.s32.totalorder %s814_s17, 3 }
   0x5   : > { %s999_s18 = smov (%p31_p1, %s29_s18), 0  ;;  %p209_p3 = pnand %p636_p0, %p208_p2 }
   0x6   : > { %p265_p4 = scmp.eq.s32.totalorder (!%p209_p3), %s806_s15, 0 }
   0x7   : > { %212 = sbr.rel (%p209_p3) target bundleno = 780 (0x30c), region = 36 }
   0xe   : > { %270 = sbr.rel (!%p265_p4) target bundleno = 21 (0x15), region = 40  ;;  %vm271_vm0 = vcmask (%p265_p4), 7168   ;;  %v816_v0 = vmov (%p265_p4), 1e+30   ;;  %v817_v1 = vmov (%p265_p4), -1e+30  }
   0xf   : > { %272 = vst.msk [vmem:[#allocation2] sm:$0xff] (%p265_p4), %vm271_vm0, %v816_v0  ;;  %273 = vst.msk [vmem:[#allocation3] sm:$0xff] (%p265_p4), %vm271_vm0, %v817_v1  ;;  %v818_v2 = vmov (%p265_p4), 0.0  }
  0x10   : > { %274 = vst.msk [vmem:[#allocation4] sm:$0xff] (%p265_p4), %vm271_vm0, %v818_v2  ;;  %275 = vst.msk [vmem:[#allocation5] sm:$0xff] (%p265_p4), %vm271_vm0, %v818_v2 }
  0x15 PF: > { %v277_v3 = vld [vmem:[%s986_s1] sm:$0xff]  ;;  %v278_v4 = vld [vmem:[%s986_s1 + $0x8] sm:$0xff]  ;;  %vm293_vm1 = vcmask 261120   ;;  %v819_v5 = vmov 0.0|0.0   ;;  %vm820_vm3 = vmmov 0   ;;  %v821_v8 = vmov 0.0  }
  0x16   : > { %718 = vmatprep.subr.bf16.mxu0 %v819_v5  ;;  %v719_v6 = vpack.c.bf16 %v278_v4, %v277_v3  ;;  %vm880_vm2 = vmpackc.low %vm293_vm1, %vm293_vm1  ;;  %715 = vmatprep.mubr.msk.f32.mxu0 %vm820_vm3, %v821_v8  ;;  %v822_v9 = vmov 0   ;;  %v279_v10 = vld [vmem:[%s986_s1 + $0x10] sm:$0xff]  ;;  %v280_v11 = vld [vmem:[%s986_s1 + $0x18] sm:$0xff]  ;;  %v416_v33 = vlaneseq  ;;  %vm823_vm6 = vmmov 1   ;;  %p656_p5 = scmp.ne.s32.totalorder %s806_s15, 0 }
  0x17   : > { %784 = vset.pattern.permute.xlu0 %v822_v9  ;;  %v427_v12 = vld [vmem:[%s987_s2] sm:$0xff]  ;;  %v723_v13 = vpack.c.bf16 %v280_v11, %v279_v10  ;;  %v282_v15 = vld [vmem:[%s986_s1 + $0x28] sm:$0xff]  ;;  %v283_v17 = vld [vmem:[%s986_s1 + $0x30] sm:$0xff]  ;;  %vm452_vm13 = vcmask (!%p656_p5), 7168  }
  0x18   : > { %721 = vmatpush3.bf16.xpose.msk.msra.mxu0 %vm880_vm2, %v719_v6  ;;  %430 = vperm.xlu0 %784, %v427_v12   ;;  %v281_v14 = vld [vmem:[%s986_s1 + $0x20] sm:$0xff]  ;;  %v284_v18 = vld [vmem:[%s986_s1 + $0x38] sm:$0xff]  ;;  %v286_v21 = vld [vmem:[%s986_s1 + $0x48] sm:$0xff]  ;;  %v422_v34 = vand.u32 127, %v416_v33  ;;  %v417_v38 = vshrl.u32 %v416_v33, 7 }
  0x19   : > { %722 = vmatprep.subr.bf16.mxu0 %v819_v5  ;;  %v727_v16 = vpack.c.bf16 %v282_v15, %v281_v14  ;;  %v731_v19 = vpack.c.bf16 %v284_v18, %v283_v17  ;;  %v285_v20 = vld [vmem:[%s986_s1 + $0x40] sm:$0xff]  ;;  %v287_v23 = vld [vmem:[%s986_s1 + $0x50] sm:$0xff]  ;;  %v288_v24 = vld [vmem:[%s986_s1 + $0x58] sm:$0xff] }
  0x1a   : > { %v735_v22 = vpack.c.bf16 %v286_v21, %v285_v20  ;;  %v739_v25 = vpack.c.bf16 %v288_v24, %v287_v23  ;;  %v289_v26 = vld [vmem:[%s986_s1 + $0x60] sm:$0xff]  ;;  %v290_v27 = vld [vmem:[%s986_s1 + $0x68] sm:$0xff]  ;;  %v291_v29 = vld [vmem:[%s986_s1 + $0x70] sm:$0xff]  ;;  %vm426_vm4 = vcmp.lt.s32.totalorder %v422_v34, 8  ;;  %vm425_vm9 = vcmp.ne.s32.totalorder %v417_v38, %v422_v34 }
  0x1b   : > { %v743_v28 = vpack.c.bf16 %v290_v27, %v289_v26  ;;  %v292_v30 = vld [vmem:[%s986_s1 + $0x78] sm:$0xff]  ;;  %v276_v32 = vld [vmem:[%s985_s0] sm:$0xff]  ;;  %v454_v47 = vld [vmem:[#allocation3] sm:$0xff] (!%p656_p5) }
  0x1c   : > { %v747_v31 = vpack.c.bf16 %v292_v30, %v291_v29  ;;  %v655_v35 = vld [vmem:[%s988_s3] ss:$0 sm:$0xff] }
  0x1d   : > { %v447_v44 = vld [vmem:[#allocation2] sm:$0xff] (!%p656_p5) }
  0x20   : > { %725 = vmatpush3.bf16.xpose.msk.msra.mxu0 %vm880_vm2, %v723_v13 }
  0x21   : > { %726 = vmatprep.subr.bf16.mxu0 %v819_v5 }
  0x28   : > { %729 = vmatpush3.bf16.xpose.msk.msra.mxu0 %vm880_vm2, %v727_v16 }
  0x29   : > { %730 = vmatprep.subr.bf16.mxu0 %v819_v5 }
  0x30   : > { %733 = vmatpush3.bf16.xpose.msk.msra.mxu0 %vm880_vm2, %v731_v19 }
  0x31   : > { %734 = vmatprep.subr.bf16.mxu0 %v819_v5 }
  0x38   : > { %737 = vmatpush3.bf16.xpose.msk.msra.mxu0 %vm880_vm2, %v735_v22 }
  0x39   : > { %738 = vmatprep.subr.bf16.mxu0 %v819_v5 }
  0x40   : > { %741 = vmatpush3.bf16.xpose.msk.msra.mxu0 %vm880_vm2, %v739_v25 }
  0x41   : > { %742 = vmatprep.subr.bf16.mxu0 %v819_v5 }
  0x48   : > { %745 = vmatpush3.bf16.xpose.msk.msra.mxu0 %vm880_vm2, %v743_v28 }
  0x49   : > { %746 = vmatprep.subr.bf16.mxu0 %v819_v5 }
  0x50   : > { %749 = vmatpush3.bf16.xpose.msk.msra.mxu0 %vm880_vm2, %v747_v31 }
  0x57   : > { %716 = vmatmul.mubr.msk.f32.vlgmr.msra.gmra.mrb[0].mxu0 %vm293_vm1, %v276_v32 }
  0x97   : > { %v431_v36 = vpop.permute.xlu0 %430 }
  0x98   : > { %vm436_vm5 = vcmp.eq.s32.totalorder %v431_v36, %v655_v35 }
  0x99   : > { %vm440_vm7 = vmxor %vm436_vm5, %vm823_vm6 }
  0x9a   : > { %vm952_vm8 = vmand %vm440_vm7, %vm426_vm4 }
  0x9b   : > { %vm437_vm10 = vmand %vm436_vm5, %vm425_vm9 }
 0x126   : > { %446 = sbr.rel (%p656_p5) target bundleno = 451 (0x1c3), region = 44 }
 0x12a   : > { %v411_v39 = vpop.f32.mrb[0].mxu0 }
 0x12b   : > { %vm438_vm11 = vcmp.lt.f32.partialorder %v411_v39, 0.999  ;;  %v717_v40 = vpop.f32.mrb[1].mxu0  ;;  %v455_v43 = vsel (!%p656_p5), %vm952_vm8, %v411_v39, -1e+30 }
 0x12c   : > { %vm956_vm12 = vmand %vm437_vm10, %vm438_vm11 }
 0x12d   : > { %v448_v42 = vsel %vm956_vm12, %v411_v39, 1e+30 }
 0x12e   : > { %449 = vmin.xlane.f32.xlu0 %v448_v42 }
 0x132   : > { %456 = vmax.xlane.f32.xlu0 %v455_v43 }
 0x1bb   : > { %v450_v45 = vpop.xlane.xlu0 %449 }
 0x1bc   : > { %v451_v46 = vmin.f32 %v447_v44, %v450_v45 }
 0x1be   : > { %453 = vst.msk [vmem:[#allocation2] sm:$0xff] %vm452_vm13, %v451_v46 }
 0x1bf   : > { %v457_v48 = vpop.xlane.xlu0 %456 }
 0x1c0   : > { %v458_v49 = vmax.f32 %v454_v47, %v457_v48 }
 0x1c2   : > { %459 = vst.msk [vmem:[#allocation3] sm:$0xff] %vm452_vm13, %v458_v49 }
 0x1c3 PF: > { %p460_p6 = scmp.eq.s32.totalorder %s806_s15, 1  ;;  %p657_p7 = scmp.ne.s32.totalorder %s806_s15, 1 }
 0x1c4   : > { %v824_v52 = vmov (!%p657_p7), 0   ;;  %v825_v56 = vmov (!%p657_p7), -10.0   ;;  %v486_v0 = vld [vmem:[#allocation4] sm:$0xff] (!%p657_p7)  ;;  %vm491_vm2 = vcmask (!%p657_p7), 7168   ;;  %v493_v3 = vld [vmem:[#allocation5] sm:$0xff] (!%p657_p7) }
 0x1c5   : > { %463 = sbr.rel (%p657_p7) target bundleno = 752 (0x2f0), region = 48  ;;  %v464_v50 = vld [vmem:[#allocation2] sm:$0xff] (!%p657_p7)  ;;  %785 = vset.pattern.permute.xlu0 (!%p657_p7), %v824_v52 }
 0x1c6   : > { %v658_v53 = vadd.f32 (!%p657_p7), -0.1, %v464_v50 }
 0x1c8   : > { %470 = vperm.xlu0 (!%p657_p7), %785, %v658_v53  }
 0x1c9   : > { %v466_v51 = vld [vmem:[#allocation3] sm:$0xff] (!%p657_p7) }
 0x1ca   : > { %v467_v54 = vadd.f32 (!%p657_p7), 0.1, %v466_v51 }
 0x1cc   : > { %477 = vperm.xlu0 %785, %v467_v54  }
 0x247   : > { %v471_v55 = vpop.permute.xlu0 %470 }
 0x248   : > { %vm473_vm14 = vcmp.gt.f32.partialorder %v411_v39, %v471_v55 }
 0x249   : > { %vm474_vm15 = vmand %vm952_vm8, %vm473_vm14 }
 0x24a   : > { %v482_v57 = vsel %vm474_vm15, 10.0, %v825_v56 }
 0x24b   : > { %v483_v58 = vmul.f32 %v482_v57, %v411_v39  ;;  %v478_v60 = vpop.permute.xlu0 %477 }
 0x24c   : > { %vm480_vm0 = vcmp.lt.f32.partialorder %v411_v39, %v478_v60 }
 0x24d   : > { %v484_v59 = vmul.f32 1.442695, %v483_v58  ;;  %vm481_vm1 = vmand %vm956_vm12, %vm480_vm0 }
 0x24f   : > { %786 = vpow2.f32 %v484_v59 }
 0x259   : > { %v787_v61 = vpop.eup %786 }
 0x25a   : > { %v487_v62 = vsel %vm481_vm1, %v787_v61, 0.0  ;;  %v494_v63 = vsel %vm474_vm15, %v787_v61, 0.0 }
 0x25b   : > { %488 = vadd.xlane.f32.xlu1 %v487_v62 }
 0x25f   : > { %495 = vadd.xlane.f32.xlu1 %v494_v63 }
 0x2e8   : > { %v489_v1 = vpop.xlane.xlu1 %488 }
 0x2e9   : > { %v490_v2 = vadd.f32 %v489_v1, %v486_v0 }
 0x2eb   : > { %492 = vst.msk [vmem:[#allocation4] sm:$0xff] %vm491_vm2, %v490_v2 }
 0x2ec   : > { %v496_v4 = vpop.xlane.xlu1 %495 }
 0x2ed   : > { %v497_v5 = vadd.f32 %v496_v4, %v493_v3 }
 0x2ef   : > { %498 = vst.msk [vmem:[#allocation5] sm:$0xff] %vm491_vm2, %v497_v5 }
 0x2f0 PF: > { %502 = sbr.rel (!%p460_p6) target bundleno = 780 (0x30c), region = 52  ;;  %v513_v10 = vld [vmem:[#allocation2] sm:$0xff] (%p460_p6)  ;;  %v515_v16 = vld [vmem:[#allocation3] sm:$0xff] (%p460_p6)  ;;  %vm521_vm4 = vcmask (%p460_p6), 7168  }
 0x2f1   : > { %v660_v14 = vadd.f32 (%p460_p6), -0.1, %v513_v10 }
 0x2f2   : > { %v503_v6 = vld [vmem:[#allocation4] sm:$0xff] (%p460_p6) }
 0x2f3   : > { %v504_v8 = vmax.f32 (%p460_p6), %v503_v6, 1e-30  ;;  %vm516_vm3 = vcmp.lt.f32.partialorder (%p460_p6), %v660_v14, %v515_v16 }
 0x2f5   : > { %788 = vlog2.f32 (%p460_p6), %v504_v8 }
 0x2f6   : > { %v508_v7 = vld [vmem:[#allocation5] sm:$0xff] (%p460_p6) }
 0x2f7   : > { %v509_v9 = vmax.f32 %v508_v7, 1e-30 }
 0x2f9   : > { %790 = vlog2.f32 %v509_v9 }
 0x2ff   : > { %v789_v11 = vpop.eup %788 }
 0x300   : > { %v506_v13 = vmul.f32 0.6931472, %v789_v11 }
 0x302   : > { %v507_v17 = vmul.f32 0.2, %v506_v13 }
 0x303   : > { %v791_v12 = vpop.eup %790 }
 0x304   : > { %v511_v15 = vmul.f32 0.6931472, %v791_v12 }
 0x306   : > { %v512_v18 = vmul.f32 0.2, %v511_v15 }
 0x308   : > { %v519_v19 = vadd.f32 %v512_v18, %v507_v17 }
 0x30a   : > { %v520_v20 = vsel %vm516_vm3, %v519_v19, 0.0 }
 0x30b   : > { %522 = vst.msk [vmem:[%s989_s4] sm:$0xff] %vm521_vm4, %v520_v20 }
 0x30c PF: > { %s14_s17 = sadd.s32 1, %s814_s17   ;;  %s996_s15 = smov %s810_s16 }
 0x30d   : > { %p11_p8 = scmp.ge.s32.totalorder %s14_s17, 4   ;;  %s997_s16 = smov %s999_s18 }
 0x30f   :  { %13 = sbr.rel (!%p11_p8) target bundleno = 2 (0x2), region = 91 }

</bundles_post_ra>
